<compile_context>
chip_gen: v7x
topology: tpu7x:2x2x1
jax: 0.10.0
libtpu: 0.0.40
codegen_flags: <defaults>
</compile_context>

<pallas_src>
import functools

import jax
import jax.numpy as jnp
from jax import lax
from jax.experimental import pallas as pl
from jax.experimental.pallas import tpu as pltpu


def _round_up(x, m):
    return ((x + m - 1) // m) * m


def _attention_filter_kernel(lab_ref, enc_ref, out_ref, acc_ref, *, n_valid):
    """lab_ref: (TILE_N, 1) f32   enc_ref: (TILE_N, H) native dtype
       out_ref: (1, H) f32 partial sum for this core-split
       acc_ref: (8, H) f32 scratch accumulator (resident across the inner grid axis)."""
    c = pl.program_id(0)          # core-split index ("parallel")
    i = pl.program_id(1)          # N-tile index within the split ("arbitrary")
    n_inner = pl.num_programs(1)

    tile_n, h = enc_ref.shape

    @pl.when(i == 0)
    def _():
        acc_ref[...] = jnp.zeros_like(acc_ref)

    # Global (unclamped) row indices of this tile; rows >= n_valid are either the
    # ragged tail of the last real tile or a fully-phantom tile (clamped block index)
    # and must contribute exactly 0 even if the VMEM garbage there is NaN/Inf.
    start = (c * n_inner + i) * tile_n
    rows = start + lax.broadcasted_iota(jnp.int32, (tile_n, 1), 0)
    valid = rows < n_valid

    # VPU multiply-accumulate: prod is masked, then folded into the (8, H) scratch
    # with pure VALU adds (no per-tile cross-sublane reduce).
    prod = jnp.where(valid, lab_ref[...] * enc_ref[...].astype(jnp.float32), 0.0)
    acc_ref[...] += prod.reshape(tile_n // 8, 8, h).sum(axis=0)

    @pl.when(i == n_inner - 1)
    def _():
        # Single XLU sublane reduce at the very end of this core-split.
        out_ref[...] = acc_ref[...].sum(axis=0, keepdims=True).astype(out_ref.dtype)


def _tile_params(n, h, enc_dtype):
    """Pick tile_n (rows per grid step) and the scoped-VMEM limit from the chip."""
    itemsize = jnp.dtype(enc_dtype).itemsize
    try:
        info = pltpu.get_tpu_info()
        vmem_cap = int(getattr(info, "vmem_capacity_bytes", 64 * 1024 * 1024))
    except Exception:
        vmem_cap = 64 * 1024 * 1024  # conservative fallback (v7x-sized)

    if vmem_cap >= 100 * 1024 * 1024:        # v5e / v6e: 128 MiB physical VMEM
        per_buf_budget = 20 * 1024 * 1024
        vmem_limit = 64 * 1024 * 1024
    else:                                    # v7x: 64 MiB physical per core
        per_buf_budget = 10 * 1024 * 1024
        vmem_limit = 36 * 1024 * 1024

    # Per-row VMEM cost of one pipeline buffer: enc row (lane-padded) + the
    # lane-padded f32 labels column (128 lanes * 4 B per row within an (8,128) tile).
    per_row = _round_up(h, 128) * itemsize + 512
    rows = max(8, per_buf_budget // per_row)
    if rows >= 512:
        tile_n = (rows // 256) * 256         # big, 256-aligned tiles
    else:
        tile_n = max(8, (rows // 8) * 8)     # huge-H: at least sublane-aligned

    tile_n = max(8, min(tile_n, _round_up(n, 8)))   # never allocate far past N
    return tile_n, vmem_limit


def attention_with_filter(encoder_outputs, labels,
                          w1=None, b1=None, w2=None, b2=None, *, tile_n=None):
    """encoder_outputs: (N, H), labels: (N,). Returns (outputs (H,), weights (N, 1)).

    w1/b1/w2/b2 (the projection parameters) are accepted for API parity with the
    PyTorch module but have no effect on the forward result: softmax over the
    size-1 energy axis makes `weights` identically 1.0, so the projection is a
    mathematical no-op for this forward pass."""
    del w1, b1, w2, b2

    N, H = encoder_outputs.shape
    out_dtype = jnp.result_type(encoder_outputs.dtype, labels.dtype)

    auto_tile, vmem_limit = _tile_params(N, H, encoder_outputs.dtype)
    if tile_n is None:
        tile_n = auto_tile
    assert tile_n % 8 == 0

    n_tiles = pl.cdiv(N, tile_n)
    num_splits = 2 if n_tiles >= 2 else 1     # 2-TensorCore split on v7x; serial on 1-TC
    tps = pl.cdiv(n_tiles, num_splits)        # tiles per split

    # Labels are tiny: cast to f32 and zero-pad so every labels block is in-bounds.
    # encoder_outputs is NOT copied/padded/cast in the wrapper — it streams as-is.
    lab = labels.astype(jnp.float32).reshape(N, 1)
    n_lab = n_tiles * tile_n
    if n_lab != N:
        lab = jnp.pad(lab, ((0, n_lab - N), (0, 0)))

    last_blk = n_tiles - 1

    def blk_idx(c, i):
        # Clamp so "phantom" steps (odd tile count split across 2 cores) stay in
        # bounds; the in-kernel row mask zeroes their contribution.
        return (jnp.minimum(c * tps + i, last_blk), 0)

    kernel = functools.partial(_attention_filter_kernel, n_valid=N)

    parts = pl.pallas_call(
        kernel,
        out_shape=jax.ShapeDtypeStruct((num_splits, H), jnp.float32),
        grid=(num_splits, tps),
        in_specs=[
            pl.BlockSpec((tile_n, 1), blk_idx),       # labels column tile (f32)
            pl.BlockSpec((tile_n, H), blk_idx),       # encoder rows tile (native dtype)
        ],
        out_specs=pl.BlockSpec((1, H), lambda c, i: (c, 0)),
        scratch_shapes=[pltpu.VMEM((8, H), jnp.float32)],
        compiler_params=pltpu.CompilerParams(
            dimension_semantics=("parallel", "arbitrary"),
            vmem_limit_bytes=vmem_limit,
        ),
    )(lab, encoder_outputs)

    outputs = parts.sum(axis=0).astype(out_dtype)             # combine per-core partials
    weights = jnp.ones((N, 1), dtype=out_dtype)               # softmax over size-1 axis
    return outputs, weights


def _reference(encoder_outputs, labels, w1, b1, w2, b2):
    # Full, un-simplified path (matches the PyTorch module exactly).
    x = encoder_outputs * labels.reshape(-1, 1)
    h = jnp.maximum(x @ w1 + b1, 0.0)
    energy = h @ w2 + b2
    weights = jax.nn.softmax(energy, axis=1)   # size-1 axis -> all ones
    outputs = (x * weights).sum(axis=0)
    return outputs, weights


if __name__ == "__main__":
    key = jax.random.PRNGKey(0)
    N, H = 8, 32  # seq length, hidden_dim

    k_enc, k_lab, k_w1, k_b1, k_w2, k_b2 = jax.random.split(key, 6)
    encoder_outputs = jax.random.normal(k_enc, (N, H), dtype=jnp.float32)
    labels = jax.random.normal(k_lab, (N,), dtype=jnp.float32)

    # Projection params (stored transposed vs PyTorch so the reference does x @ W + b).
    w1 = jax.random.normal(k_w1, (H, H // 2), dtype=jnp.float32) * (1.0 / jnp.sqrt(H))
    b1 = jax.random.normal(k_b1, (H // 2,), dtype=jnp.float32) * 0.1
    w2 = jax.random.normal(k_w2, (H // 2, 1), dtype=jnp.float32) * (1.0 / jnp.sqrt(H // 2))
    b2 = jax.random.normal(k_b2, (1,), dtype=jnp.float32) * 0.1

    outputs, weights = jax.block_until_ready(
        attention_with_filter(encoder_outputs, labels, w1, b1, w2, b2))

    ref_out, ref_wts = _reference(encoder_outputs, labels, w1, b1, w2, b2)
    assert outputs.shape == (H,) and weights.shape == (N, 1)
    assert jnp.allclose(outputs, ref_out, atol=1e-4, rtol=1e-4)
    assert jnp.allclose(weights, ref_wts, atol=1e-6)

    # Second check: ragged multi-tile + 2-way core split + native-bf16 streaming
    # (tile_n forced small so the mask / clamp / split paths are exercised).
    N2, H2 = 520, 160
    enc2 = jax.random.normal(k_enc, (N2, H2), dtype=jnp.float32).astype(jnp.bfloat16)
    lab2 = jax.random.normal(k_lab, (N2,), dtype=jnp.float32).astype(jnp.bfloat16)
    out2, wts2 = jax.block_until_ready(attention_with_filter(enc2, lab2, tile_n=128))
    ref2 = (enc2.astype(jnp.float32) * lab2.astype(jnp.float32)[:, None]).sum(axis=0)
    assert out2.shape == (H2,) and wts2.shape == (N2, 1)
    assert jnp.allclose(out2.astype(jnp.float32), ref2, atol=5e-2, rtol=5e-2)
    assert jnp.allclose(wts2.astype(jnp.float32), jnp.ones((N2, 1)), atol=1e-6)

    print("KERNEL_OK")
</pallas_src>

<mosaic_0001>
module attributes {stable_mosaic.version = 11 : i64} {
  func.func @_attention_filter_kernel(%arg0: i32, %arg1: i32, %arg2: memref<8x1xf32, #tpu.memory_space<vmem>>, %arg3: memref<8x32xf32, #tpu.memory_space<vmem>>, %arg4: memref<1x32xf32, #tpu.memory_space<vmem>>, %arg5: memref<8x32xf32, #tpu.memory_space<vmem>>) attributes {dimension_semantics = [#tpu.dimension_semantics<parallel>, #tpu.dimension_semantics<arbitrary>], iteration_bounds = array<i64: 1, 1>, scalar_prefetch = 0 : i64, scratch_operands = 1 : i64, tpu.core_type = #tpu.core_type<tc>, window_params = [{transform_indices = @transform_0, window_bounds = array<i64: 8, 1>}, {transform_indices = @transform_1, window_bounds = array<i64: 8, 32>}, {transform_indices = @transform_2, window_bounds = array<i64: 1, 32>}]} {
    %c0_i32 = arith.constant 0 : i32
    %0 = arith.cmpi eq, %arg1, %c0_i32 : i32
    %1 = arith.extui %0 : i1 to i32
    %c0_i32_0 = arith.constant 0 : i32
    %2 = arith.cmpi ne, %1, %c0_i32_0 : i32
    scf.if %2 {
      %cst_12 = arith.constant 0.000000e+00 : f32
      %27 = vector.broadcast %cst_12 : f32 to vector<8x32xf32>
      %c0_13 = arith.constant 0 : index
      %c0_14 = arith.constant 0 : index
      %28 = vector.load %arg5[%c0_13, %c0_14] : memref<8x32xf32, #tpu.memory_space<vmem>>, vector<8x32xf32>
      tpu.vector_store %arg5[%c0_13, %c0_14], %27 {strides = array<i32>} : memref<8x32xf32, #tpu.memory_space<vmem>>, vector<8x32xf32>,
    } else {
    }
    %c1_i32 = arith.constant 1 : i32
    %3 = arith.muli %arg0, %c1_i32 : i32
    %4 = arith.addi %3, %arg1 : i32
    %c8_i32 = arith.constant 8 : i32
    %5 = arith.muli %4, %c8_i32 : i32
    %6 = tpu.iota {dimensions = array<i32: 0>} : vector<8x1xi32>
    %7 = vector.broadcast %5 : i32 to vector<8x1xi32>
    %8 = arith.addi %7, %6 : vector<8x1xi32>
    %c8_i32_1 = arith.constant 8 : i32
    %9 = vector.broadcast %c8_i32_1 : i32 to vector<8x1xi32>
    %10 = arith.cmpi slt, %8, %9 : vector<8x1xi32>
    %c0 = arith.constant 0 : index
    %c0_2 = arith.constant 0 : index
    %11 = vector.load %arg2[%c0, %c0_2] : memref<8x1xf32, #tpu.memory_space<vmem>>, vector<8x1xf32>
    %c0_3 = arith.constant 0 : index
    %c0_4 = arith.constant 0 : index
    %12 = vector.load %arg3[%c0_3, %c0_4] : memref<8x32xf32, #tpu.memory_space<vmem>>, vector<8x32xf32>
    %13 = vector.broadcast %11 : vector<8x1xf32> to vector<8x32xf32>
    %14 = arith.mulf %13, %12 : vector<8x32xf32>
    %cst = arith.constant 0.000000e+00 : f32
    %15 = vector.shape_cast %10 : vector<8x1xi1> to vector<8x1xi1>
    %16 = vector.broadcast %15 : vector<8x1xi1> to vector<8x32xi1>
    %17 = vector.broadcast %cst : f32 to vector<8x32xf32>
    %18 = arith.select %16, %14, %17 : vector<8x32xi1>, vector<8x32xf32>
    %c0_5 = arith.constant 0 : index
    %c0_6 = arith.constant 0 : index
    %19 = vector.load %arg5[%c0_5, %c0_6] : memref<8x32xf32, #tpu.memory_space<vmem>>, vector<8x32xf32>
    %20 = vector.shape_cast %18 : vector<8x32xf32> to vector<1x8x32xf32>
    %cst_7 = arith.constant dense<0.000000e+00> : vector<8x32xf32>
    %21 = vector.multi_reduction <add>, %20, %cst_7 [0] : vector<1x8x32xf32> to vector<8x32xf32>
    %22 = arith.addf %19, %21 : vector<8x32xf32>
    %c0_8 = arith.constant 0 : index
    %c0_9 = arith.constant 0 : index
    %23 = vector.load %arg5[%c0_8, %c0_9] : memref<8x32xf32, #tpu.memory_space<vmem>>, vector<8x32xf32>
    tpu.vector_store %arg5[%c0_8, %c0_9], %22 {strides = array<i32>} : memref<8x32xf32, #tpu.memory_space<vmem>>, vector<8x32xf32>,
    %c0_i32_10 = arith.constant 0 : i32
    %24 = arith.cmpi eq, %arg1, %c0_i32_10 : i32
    %25 = arith.extui %24 : i1 to i32
    %c0_i32_11 = arith.constant 0 : i32
    %26 = arith.cmpi ne, %25, %c0_i32_11 : i32
    scf.if %26 {
      %c0_12 = arith.constant 0 : index
      %c0_13 = arith.constant 0 : index
      %27 = vector.load %arg5[%c0_12, %c0_13] : memref<8x32xf32, #tpu.memory_space<vmem>>, vector<8x32xf32>
      %cst_14 = arith.constant dense<0.000000e+00> : vector<32xf32>
      %28 = vector.multi_reduction <add>, %27, %cst_14 [0] : vector<8x32xf32> to vector<32xf32>
      %29 = vector.shape_cast %28 : vector<32xf32> to vector<1x32xf32>
      %c0_15 = arith.constant 0 : index
      %c0_16 = arith.constant 0 : index
      %30 = vector.load %arg4[%c0_15, %c0_16] : memref<1x32xf32, #tpu.memory_space<vmem>>, vector<1x32xf32>
      tpu.vector_store %arg4[%c0_15, %c0_16], %29 {strides = array<i32>} : memref<1x32xf32, #tpu.memory_space<vmem>>, vector<1x32xf32>,
    } else {
    }
    return
  }
  func.func @transform_0(%arg0: i32, %arg1: i32) -> (i32, i32) {
    %c1_i32 = arith.constant 1 : i32
    %0 = arith.muli %arg0, %c1_i32 : i32
    %1 = arith.addi %0, %arg1 : i32
    %c0_i32 = arith.constant 0 : i32
    %2 = arith.minsi %1, %c0_i32 : i32
    %c0_i32_0 = arith.constant 0 : i32
    %c0_i32_1 = arith.constant 0 : i32
    return %2, %c0_i32_0 : i32, i32
  }
  func.func @transform_1(%arg0: i32, %arg1: i32) -> (i32, i32) {
    %c1_i32 = arith.constant 1 : i32
    %0 = arith.muli %arg0, %c1_i32 : i32
    %1 = arith.addi %0, %arg1 : i32
    %c0_i32 = arith.constant 0 : i32
    %2 = arith.minsi %1, %c0_i32 : i32
    %c0_i32_0 = arith.constant 0 : i32
    %c0_i32_1 = arith.constant 0 : i32
    return %2, %c0_i32_0 : i32, i32
  }
  func.func @transform_2(%arg0: i32, %arg1: i32) -> (i32, i32) {
    %c0_i32 = arith.constant 0 : i32
    %c0_i32_0 = arith.constant 0 : i32
    return %arg0, %c0_i32 : i32, i32
  }
}

</mosaic_0001>

<bundles_post_ra>
// kernel: tpu_custom_call.1
= control target key start
LH: loop header
LB: loop body
LE: loop exit
PB: predicated region body
PF: predicated region fallthrough
CT: control target
= control target key end

     0   :  { %vm70_vm0 = vcmask 261120   ;;  %v162_v1 = vmov 0   ;;  %v163_v2 = vmov 0.0   ;;  %s198_s0 = inlined_call_operand.vmem [shape: f32[8,1], index: 0, kind: input, shape index: {}]   ;;  %s199_s1 = inlined_call_operand.vmem [shape: f32[8,32], index: 1, kind: input, shape index: {}]   ;;  %s200_s2 = inlined_call_operand.hbm [shape: f32[1,32], index: 2, kind: output, shape index: {}]  }
   0x1   :  { %v79_v0 = vld [vmem:[%s198_s0] sm:$0xff]  ;;  %137 = vset.pattern.permute.xlu0 %v162_v1  ;;  %71 = vst.msk [vmem:[#allocation2] sm:$0xff] %vm70_vm0, %v163_v2 }
   0x2   :  { %7 = vsyncpa [#allocation4], 0  ;;  %83 = vperm.xlu0 %137, %v79_v0   ;;  %v80_v3 = vld [vmem:[%s199_s1] sm:$0xff]  ;;  %s164_s0 = smov [#allocation3]   ;;  %vm106_vm1 = vcmask 253952  }
   0x3   :  { %s114_s13 = sshll.u32 %s164_s0, 4  ;;  %s115_s13 = int_to_ptr.vmem [resolvable:$true] %s114_s13 }
   0x4   :  { %s138_s14 = scalar_lea.vmem %s115_s13, 16  ;;  %s142_s1 = scalar_lea.vmem %s115_s13, 32 }
   0x5   :  { %p139_p0 = scmp.ne.s32.totalorder %s115_s13, %s138_s14  ;;  %p143_p1 = scmp.lt.s32.totalorder %s115_s13, %s115_s13 }
   0x6   :  { %p144_p2 = scmp.lt.s32.totalorder %s142_s1, %s138_s14 }
   0x8   :  { %v90_v5 = vld [vmem:[#allocation2] sm:$0xff]  ;;  %p145_p3 = por %p144_p2, %p143_p1 }
   0xa   :  { %p146_p4 = pnand %p145_p3, %p139_p0 }
  0x81   :  { %v84_v4 = vpop.permute.xlu0 %83 }
  0x82   :  { %v86_v6 = vmul.f32 %v84_v4, %v80_v3 }
  0x84   :  { %v92_v7 = vadd.f32 %v90_v5, %v86_v6 }
  0x86   :  { %94 = vst.msk [vmem:[#allocation2] sm:$0xff] %vm70_vm0, %v92_v7 }
  0x8d   :  { %v98_v8 = vld [vmem:[#allocation2] sm:$0xff] }
  0x8e   :  { %v99_v9 = vsel %vm70_vm0, %v98_v8, 0.0 }
  0x8f   :  { %v100_v10 = vrot.slane %v99_v9, 4 }
  0x91   :  { %v101_v11 = vadd.f32 %v100_v10, %v99_v9 }
  0x93   :  { %v102_v12 = vrot.slane %v101_v11, 2 }
  0x95   :  { %v103_v13 = vadd.f32 %v102_v12, %v101_v11 }
  0x97   :  { %v104_v14 = vrot.slane %v103_v13, 1 }
  0x99   :  { %v105_v15 = vadd.f32 %v104_v14, %v103_v13 }
  0x9b   :  { %107 = vst.msk [vmem:[#allocation3] sm:$0x1] %vm106_vm1, %v105_v15 }
  0x9c   :  { %149 = shalt.err (!%p146_p4)
}
  0x9d   :  { %s150_s17 = scalar_lea.hbm %s200_s2, 16 }
  0x9e   :  { %p151_p5 = scmp.ne.s32.totalorder %s200_s2, %s150_s17  ;;  %p154_p6 = scmp.lt.u32.totalorder %s150_s17, %s200_s2 }
  0xa0   :  { %p156_p7 = pnand %p154_p6, %p151_p5 }
  0xa2   :  { %159 = shalt.err (!%p156_p7)
}
  0xa3   :  { %117 = dma.vmem_to_hbm [thread:$0]  %s115_s13, 16, %s200_s2, [#allocation4]  }
  0xa4   :  { %160 = dma.done.wait [#allocation4], 16  }
  0xa5   :  { %161 = vsyncadd [#allocation4], 4294967280 }
  0xa6   :  { %121 = vsyncpa [#allocation4], 1 }

</bundles_post_ra>
